<compile_context>
chip_gen: v7x
topology: tpu7x:2x2x1
jax: 0.10.0
libtpu: 0.0.40
codegen_flags: <defaults>
</compile_context>

<pallas_src>
import jax
import jax.numpy as jnp
from jax import lax
from jax.experimental import pallas as pl
from jax.experimental.pallas import tpu as pltpu

LAYER_NORM_EPS = 1e-12


def _round_up(x: int, m: int) -> int:
    return ((x + m - 1) // m) * m


def task_emb_kernel(ids_ref, table_ref, gamma_ref, beta_ref, out_ref):
    # ids_ref   : (TILE_N, 1) int32
    # table_ref : (T, H)      f32   (word + token_type + position, pre-summed)
    # gamma_ref : (1, H)      f32
    # beta_ref  : (1, H)      f32
    # out_ref   : (TILE_N, H) f32 (or bf16)
    T, H = table_ref.shape
    tile_n = out_ref.shape[0]

    ids = ids_ref[...]                         # (TILE_N, 1) int32
    table = table_ref[...]                     # (T, H) f32, tiny, resident

    # --- Gather via T-way select/FMA on the VPU (static unroll, T is tiny) ---
    # Out-of-range ids produce an all-zero row (matches previous kernel behavior).
    emb = jnp.zeros((tile_n, H), jnp.float32)
    for t in range(T):                         # static Python loop, T = 4
        sel = (ids == t).astype(jnp.float32)   # (TILE_N, 1)
        emb = emb + sel * table[t:t + 1, :]    # broadcast multiply-add -> (TILE_N, H)

    # --- LayerNorm over hidden dim (biased variance, centered = numerically safe) ---
    mean = jnp.mean(emb, axis=-1, keepdims=True)
    centered = emb - mean
    var = jnp.mean(centered * centered, axis=-1, keepdims=True)
    normed = centered * lax.rsqrt(var + LAYER_NORM_EPS)
    out = normed * gamma_ref[...] + beta_ref[...]   # broadcast (1, H), loaded once per step

    # TODO(synk): training-mode dropout not implemented (eval mode -> identity).
    out_ref[...] = out.astype(out_ref.dtype)


def task_embeddings(input_ids, word_table, pos_table, tok_table, gamma, beta,
                    *, tile_n=512, out_dtype=jnp.float32):
    B, S = input_ids.shape
    T, H = word_table.shape
    N = B * S

    # Tile rows: default 512 rows (~0.25 MiB f32 per buffer at H=128; comfortably
    # under the v7x 64 MiB / 32 MiB-scoped VMEM budget even double-buffered).
    tile_n = min(tile_n, _round_up(N, 8))
    tile_n = _round_up(tile_n, 8)
    n_pad = _round_up(N, tile_n)
    n_tiles = n_pad // tile_n

    # Flatten + pad ids; pad rows are sliced off after the call.
    ids_flat = input_ids.reshape(N).astype(jnp.int32)
    if n_pad != N:
        ids_flat = jnp.pad(ids_flat, (0, n_pad - N))
    ids2 = ids_flat.reshape(n_pad, 1)

    # Pre-sum the three tables (all gathered with the same index) -> 1 DMA, 1 table.
    table = (word_table + tok_table + pos_table).astype(jnp.float32)
    gamma2 = gamma.reshape(1, H).astype(jnp.float32)
    beta2 = beta.reshape(1, H).astype(jnp.float32)

    out_bytes = n_pad * H * jnp.dtype(out_dtype).itemsize
    cost = pl.CostEstimate(
        flops=int(n_pad * H * 16),                                   # gather + LN + affine
        transcendentals=int(n_pad),                                  # rsqrt per row
        bytes_accessed=int(n_pad * 4 + T * H * 4 + 2 * H * 4 + out_bytes),
    )

    out = pl.pallas_call(
        task_emb_kernel,
        out_shape=jax.ShapeDtypeStruct((n_pad, H), out_dtype),
        grid=(n_tiles,),
        in_specs=[
            pl.BlockSpec((tile_n, 1), lambda i: (i, 0)),   # ids, tiled over rows
            pl.BlockSpec((T, H), lambda i: (0, 0)),        # summed table, resident
            pl.BlockSpec((1, H), lambda i: (0, 0)),        # gamma, resident
            pl.BlockSpec((1, H), lambda i: (0, 0)),        # beta, resident
        ],
        out_specs=pl.BlockSpec((tile_n, H), lambda i: (i, 0)),  # lane-dense stores
        compiler_params=pltpu.CompilerParams(
            dimension_semantics=("parallel",),             # shard rows across TCs (v7x)
        ),
        cost_estimate=cost,
    )(ids2, table, gamma2, beta2)

    return out[:N].reshape(B, S, H)


def reference(input_ids, word_table, pos_table, tok_table, gamma, beta):
    emb = word_table[input_ids] + tok_table[input_ids] + pos_table[input_ids]
    mean = jnp.mean(emb, axis=-1, keepdims=True)
    var = jnp.mean((emb - mean) ** 2, axis=-1, keepdims=True)
    normed = (emb - mean) / jnp.sqrt(var + LAYER_NORM_EPS)
    return normed * gamma + beta


if __name__ == "__main__":
    # Config-implied shapes: pretrain_cross_attention_tasks_num = 4, small hidden/batch/seq.
    NUM_TASKS = 4
    HIDDEN = 128
    B, S = 2, 8
    INIT_RANGE = 0.02  # config.initializer_range

    key = jax.random.PRNGKey(0)
    k_ids, k_w, k_p, k_t = jax.random.split(key, 4)

    input_ids = jax.random.randint(k_ids, (B, S), 0, NUM_TASKS, dtype=jnp.int32)
    word_table = INIT_RANGE * jax.random.normal(k_w, (NUM_TASKS, HIDDEN), jnp.float32)
    pos_table = INIT_RANGE * jax.random.normal(k_p, (NUM_TASKS, HIDDEN), jnp.float32)
    tok_table = INIT_RANGE * jax.random.normal(k_t, (NUM_TASKS, HIDDEN), jnp.float32)
    gamma = jnp.ones((HIDDEN,), jnp.float32)   # nn.LayerNorm default weight
    beta = jnp.zeros((HIDDEN,), jnp.float32)   # nn.LayerNorm default bias

    # tile_n=8 at these toy sizes exercises a multi-step pipelined grid (grid=(2,)).
    out = task_embeddings(input_ids, word_table, pos_table, tok_table, gamma, beta,
                          tile_n=8)
    out = jax.block_until_ready(out)

    ref = reference(input_ids, word_table, pos_table, tok_table, gamma, beta)
    assert out.shape == (B, S, HIDDEN)
    assert jnp.allclose(out, ref, atol=1e-5, rtol=1e-5), "Pallas output mismatch vs reference"

    print("KERNEL_OK")
</pallas_src>

<mosaic_0001>
module attributes {stable_mosaic.version = 11 : i64} {
  func.func @task_emb_kernel(%arg0: i32, %arg1: memref<8x1xi32, #tpu.memory_space<vmem>>, %arg2: memref<4x128xf32, #tpu.memory_space<vmem>>, %arg3: memref<1x128xf32, #tpu.memory_space<vmem>>, %arg4: memref<1x128xf32, #tpu.memory_space<vmem>>, %arg5: memref<8x128xf32, #tpu.memory_space<vmem>>) attributes {dimension_semantics = [#tpu.dimension_semantics<parallel>], iteration_bounds = array<i64: 2>, scalar_prefetch = 0 : i64, scratch_operands = 0 : i64, tpu.core_type = #tpu.core_type<tc>, window_params = [{transform_indices = @transform_0, window_bounds = array<i64: 8, 1>}, {pipeline_mode = #tpu.pipeline_mode<synchronous>, transform_indices = @transform_1, window_bounds = array<i64: 4, 128>}, {pipeline_mode = #tpu.pipeline_mode<synchronous>, transform_indices = @transform_2, window_bounds = array<i64: 1, 128>}, {pipeline_mode = #tpu.pipeline_mode<synchronous>, transform_indices = @transform_3, window_bounds = array<i64: 1, 128>}, {transform_indices = @transform_4, window_bounds = array<i64: 8, 128>}]} {
    %c0 = arith.constant 0 : index
    %c0_0 = arith.constant 0 : index
    %0 = vector.load %arg1[%c0, %c0_0] : memref<8x1xi32, #tpu.memory_space<vmem>>, vector<8x1xi32>
    %c0_1 = arith.constant 0 : index
    %c0_2 = arith.constant 0 : index
    %1 = vector.load %arg2[%c0_1, %c0_2] : memref<4x128xf32, #tpu.memory_space<vmem>>, vector<4x128xf32>
    %cst = arith.constant 0.000000e+00 : f32
    %2 = vector.broadcast %cst : f32 to vector<8x128xf32>
    %c0_i32 = arith.constant 0 : i32
    %3 = vector.broadcast %c0_i32 : i32 to vector<8x1xi32>
    %4 = arith.cmpi eq, %0, %3 : vector<8x1xi32>
    %5 = arith.extui %4 : vector<8x1xi1> to vector<8x1xi32>
    %6 = arith.sitofp %5 : vector<8x1xi32> to vector<8x1xf32>
    %7 = vector.extract_strided_slice %1 {offsets = [0, 0], sizes = [1, 128], strides = [1, 1]} : vector<4x128xf32> to vector<1x128xf32>
    %8 = vector.broadcast %6 : vector<8x1xf32> to vector<8x128xf32>
    %9 = vector.broadcast %7 : vector<1x128xf32> to vector<8x128xf32>
    %10 = arith.mulf %8, %9 : vector<8x128xf32>
    %11 = arith.addf %2, %10 : vector<8x128xf32>
    %c1_i32 = arith.constant 1 : i32
    %12 = vector.broadcast %c1_i32 : i32 to vector<8x1xi32>
    %13 = arith.cmpi eq, %0, %12 : vector<8x1xi32>
    %14 = arith.extui %13 : vector<8x1xi1> to vector<8x1xi32>
    %15 = arith.sitofp %14 : vector<8x1xi32> to vector<8x1xf32>
    %16 = vector.extract_strided_slice %1 {offsets = [1, 0], sizes = [1, 128], strides = [1, 1]} : vector<4x128xf32> to vector<1x128xf32>
    %17 = vector.broadcast %15 : vector<8x1xf32> to vector<8x128xf32>
    %18 = vector.broadcast %16 : vector<1x128xf32> to vector<8x128xf32>
    %19 = arith.mulf %17, %18 : vector<8x128xf32>
    %20 = arith.addf %11, %19 : vector<8x128xf32>
    %c2_i32 = arith.constant 2 : i32
    %21 = vector.broadcast %c2_i32 : i32 to vector<8x1xi32>
    %22 = arith.cmpi eq, %0, %21 : vector<8x1xi32>
    %23 = arith.extui %22 : vector<8x1xi1> to vector<8x1xi32>
    %24 = arith.sitofp %23 : vector<8x1xi32> to vector<8x1xf32>
    %25 = vector.extract_strided_slice %1 {offsets = [2, 0], sizes = [1, 128], strides = [1, 1]} : vector<4x128xf32> to vector<1x128xf32>
    %26 = vector.broadcast %24 : vector<8x1xf32> to vector<8x128xf32>
    %27 = vector.broadcast %25 : vector<1x128xf32> to vector<8x128xf32>
    %28 = arith.mulf %26, %27 : vector<8x128xf32>
    %29 = arith.addf %20, %28 : vector<8x128xf32>
    %c3_i32 = arith.constant 3 : i32
    %30 = vector.broadcast %c3_i32 : i32 to vector<8x1xi32>
    %31 = arith.cmpi eq, %0, %30 : vector<8x1xi32>
    %32 = arith.extui %31 : vector<8x1xi1> to vector<8x1xi32>
    %33 = arith.sitofp %32 : vector<8x1xi32> to vector<8x1xf32>
    %34 = vector.extract_strided_slice %1 {offsets = [3, 0], sizes = [1, 128], strides = [1, 1]} : vector<4x128xf32> to vector<1x128xf32>
    %35 = vector.broadcast %33 : vector<8x1xf32> to vector<8x128xf32>
    %36 = vector.broadcast %34 : vector<1x128xf32> to vector<8x128xf32>
    %37 = arith.mulf %35, %36 : vector<8x128xf32>
    %38 = arith.addf %29, %37 : vector<8x128xf32>
    %cst_3 = arith.constant dense<0.000000e+00> : vector<8xf32>
    %39 = vector.multi_reduction <add>, %38, %cst_3 [1] : vector<8x128xf32> to vector<8xf32>
    %40 = vector.shape_cast %39 : vector<8xf32> to vector<8x1xf32>
    %cst_4 = arith.constant 1.280000e+02 : f32
    %41 = vector.broadcast %cst_4 : f32 to vector<8x1xf32>
    %42 = arith.divf %40, %41 : vector<8x1xf32>
    %43 = vector.broadcast %42 : vector<8x1xf32> to vector<8x128xf32>
    %44 = arith.subf %38, %43 : vector<8x128xf32>
    %45 = arith.mulf %44, %44 : vector<8x128xf32>
    %cst_5 = arith.constant dense<0.000000e+00> : vector<8xf32>
    %46 = vector.multi_reduction <add>, %45, %cst_5 [1] : vector<8x128xf32> to vector<8xf32>
    %47 = vector.shape_cast %46 : vector<8xf32> to vector<8x1xf32>
    %cst_6 = arith.constant 1.280000e+02 : f32
    %48 = vector.broadcast %cst_6 : f32 to vector<8x1xf32>
    %49 = arith.divf %47, %48 : vector<8x1xf32>
    %cst_7 = arith.constant 9.99999996E-13 : f32
    %50 = vector.broadcast %cst_7 : f32 to vector<8x1xf32>
    %51 = arith.addf %49, %50 : vector<8x1xf32>
    %52 = math.rsqrt %51 : vector<8x1xf32>
    %53 = vector.broadcast %52 : vector<8x1xf32> to vector<8x128xf32>
    %54 = arith.mulf %44, %53 : vector<8x128xf32>
    %c0_8 = arith.constant 0 : index
    %c0_9 = arith.constant 0 : index
    %55 = vector.load %arg3[%c0_8, %c0_9] : memref<1x128xf32, #tpu.memory_space<vmem>>, vector<1x128xf32>
    %56 = vector.broadcast %55 : vector<1x128xf32> to vector<8x128xf32>
    %57 = arith.mulf %54, %56 : vector<8x128xf32>
    %c0_10 = arith.constant 0 : index
    %c0_11 = arith.constant 0 : index
    %58 = vector.load %arg4[%c0_10, %c0_11] : memref<1x128xf32, #tpu.memory_space<vmem>>, vector<1x128xf32>
    %59 = vector.broadcast %58 : vector<1x128xf32> to vector<8x128xf32>
    %60 = arith.addf %57, %59 : vector<8x128xf32>
    %c0_12 = arith.constant 0 : index
    %c0_13 = arith.constant 0 : index
    %61 = vector.load %arg5[%c0_12, %c0_13] : memref<8x128xf32, #tpu.memory_space<vmem>>, vector<8x128xf32>
    tpu.vector_store %arg5[%c0_12, %c0_13], %60 {strides = array<i32>} : memref<8x128xf32, #tpu.memory_space<vmem>>, vector<8x128xf32>,
    return
  }
  func.func @transform_0(%arg0: i32) -> (i32, i32) {
    %c0_i32 = arith.constant 0 : i32
    %c0_i32_0 = arith.constant 0 : i32
    return %arg0, %c0_i32 : i32, i32
  }
  func.func @transform_1(%arg0: i32) -> (i32, i32) {
    %c0_i32 = arith.constant 0 : i32
    %c0_i32_0 = arith.constant 0 : i32
    %c0_i32_1 = arith.constant 0 : i32
    return %c0_i32, %c0_i32_0 : i32, i32
  }
  func.func @transform_2(%arg0: i32) -> (i32, i32) {
    %c0_i32 = arith.constant 0 : i32
    %c0_i32_0 = arith.constant 0 : i32
    %c0_i32_1 = arith.constant 0 : i32
    return %c0_i32, %c0_i32_0 : i32, i32
  }
  func.func @transform_3(%arg0: i32) -> (i32, i32) {
    %c0_i32 = arith.constant 0 : i32
    %c0_i32_0 = arith.constant 0 : i32
    %c0_i32_1 = arith.constant 0 : i32
    return %c0_i32, %c0_i32_0 : i32, i32
  }
  func.func @transform_4(%arg0: i32) -> (i32, i32) {
    %c0_i32 = arith.constant 0 : i32
    %c0_i32_0 = arith.constant 0 : i32
    return %arg0, %c0_i32 : i32, i32
  }
}

</mosaic_0001>

<bundles_post_ra>
// kernel: tpu_custom_call.1
= control target key start
LH: loop header
LB: loop body
LE: loop exit
PB: predicated region body
PF: predicated region fallthrough
CT: control target
= control target key end

     0   :  { %9 = vsyncpa [#allocation3], 0  ;;  %s620_s0 = inlined_call_operand.vmem [shape: s32[16,1], index: 0, kind: input, shape index: {}]   ;;  %s621_s1 = inlined_call_operand.vmem [shape: f32[4,128], index: 1, kind: input, shape index: {}]   ;;  %s622_s2 = inlined_call_operand.vmem [shape: f32[1,128], index: 2, kind: input, shape index: {}]   ;;  %s623_s3 = inlined_call_operand.vmem [shape: f32[1,128], index: 3, kind: input, shape index: {}]   ;;  %s624_s4 = inlined_call_operand.hbm [shape: f32[16,128], index: 4, kind: output, shape index: {}]  }
   0x1   :  { %11 = vsyncpa [#allocation3 + $0x1], 0  ;;  %s511_s15 = smov 0   ;;  %s513_s16 = smov 0  }
   0x2   :  { %s515_s17 = smov 0   ;;  %s517_s18 = smov 0  }
   0x3 LB: > { %s532_s19 = sadd.s32 4294967295, %s481_s18   ;;  %s353_s20 = sadd.s32 4294967294, %s481_s18   ;;  %s481_s18 = sphi %s517_s18, %s630_s18   ;;  %s477_s17 = sphi %s515_s17, %s629_s17   ;;  %s473_s16 = sphi %s513_s16, %s628_s16   ;;  %s469_s15 = sphi %s511_s15, %s627_s15  }
   0x4   : > { %s536_s21 = sadd.s32 1, %s481_s18   ;;  %s113_s22 = sadd.s32 1, %s477_s17 }
   0x5   : > { %s110_s23 = ssub.s32 %s481_s18, %s536_s21  ;;  %p123_p0 = scmp.ne.s32.totalorder %s477_s17, %s473_s16 }
   0x6   : > { %p111_p1 = scmp.eq.s32.totalorder %s110_s23, 0  ;;  %p124_p2 = scmp.eq.s32.totalorder %s532_s19, 1 }
   0x7   : > { %p129_p3 = scmp.ne.s32.totalorder %s473_s16, %s469_s15  ;;  %p130_p4 = scmp.eq.s32.totalorder %s353_s20, 1 }
   0x8   : > { %s547_s24 = scalar_select %p111_p1, %s477_s17, %s113_s22  }
   0x9   : > { %p549_p5 = por %p124_p2, %p123_p0  ;;  %p553_p6 = por %p130_p4, %p129_p3 }
   0xa   : > { %p356_p7 = scmp.ge.s32.totalorder %s481_s18, 1  ;;  %p164_p8 = scmp.lt.s32.totalorder %s481_s18, 3 }
   0xc   : > { %p165_p9 = pnand %p356_p7, %p164_p8 }
   0xd   : > { %p189_p10 = scmp.lt.s32.totalorder (!%p165_p9), %s532_s19, 1  ;;  %v483_v0 = vmov (!%p165_p9), 0   ;;  %v484_v2 = vmov (!%p165_p9), 0.0   ;;  %v203_v8 = vlaneseq (!%p165_p9)  ;;  %v194_v12 = vld [vmem:[%s621_s1] sm:$0xf] (!%p165_p9)  ;;  %s186_s8 = sand.u32 (!%p165_p9), 1, %s473_s16  }
   0xe   : > { %168 = sbr.rel (%p165_p9) target bundleno = 493 (0x1ed), region = 36  ;;  %410 = vset.pattern.permute.xlu0 (!%p165_p9), %v483_v0  ;;  %416 = vset.pattern.permute.xlu1 (!%p165_p9), %v483_v0  ;;  %s357_s9 = sshll.u32 (!%p165_p9), %s186_s8, 3  ;;  %v363_v39 = vld [vmem:[%s622_s2] ss:$0 sm:$0xff] (!%p165_p9) }
   0xf   : > { %v204_v9 = vshrl.u32 (!%p165_p9), %v203_v8, 7  ;;  %v364_v41 = vld [vmem:[%s623_s3] ss:$0 sm:$0xff] (!%p165_p9)  ;;  %s366_s14 = sshll.u32 (!%p165_p9), %s532_s19, 7  ;;  %s188_s20 = scalar_lea.vmem (!%p165_p9), [#allocation2], %s357_s9 }
  0x10   : > { %s294_s22 = sshll.u32 (!%p165_p9), %s188_s20, 4  ;;  %s281_s29 = scalar_lea.sflag (!%p165_p9), [#allocation3], %s186_s8  ;;  %s580_s22 = int_to_ptr.vmem [resolvable:$true] %s294_s22 }
  0x11   : > { %v205_v10 = vsub.s32 (!%p165_p9), 0, %v204_v9  ;;  %v219_v11 = vsub.s32 (!%p165_p9), 1, %v204_v9  ;;  %v233_v13 = vsub.s32 (!%p165_p9), 2, %v204_v9  ;;  %v247_v14 = vsub.s32 (!%p165_p9), 3, %v204_v9  ;;  %s419_s30 = scalar_lea.vmem (!%p165_p9), %s580_s22, 128 }
  0x12   : > { %p420_p11 = scmp.ne.s32.totalorder (!%p165_p9), %s580_s22, %s419_s30 }
  0x13   : > { %v206_v15 = vrot.slane (!%p165_p9), %v194_v12, %v205_v10  ;;  %v220_v16 = vrot.slane (!%p165_p9), %v194_v12, %v219_v11  ;;  %v234_v20 = vrot.slane (!%p165_p9), %v194_v12, %v233_v13  ;;  %v248_v21 = vrot.slane (!%p165_p9), %v194_v12, %v247_v14 }
  0x14   : > { %p421_p12 = pnand (!%p165_p9), %p420_p11, %p549_p5 }
  0x15   : > { %s190_s27 = scalar_select %p189_p10, %s532_s19, 1 }
  0x16   : > { %p422_p13 = pneg %p421_p12  ;;  %s485_s19 = smov [#allocation2]  }
  0x17   : > { %s358_s28 = sshll.u32 %s190_s27, 3 }
  0x18   : > { %s192_s5 = scalar_lea.vmem %s620_s0, %s358_s28  ;;  %s578_s28 = scalar_lea.hbm %s624_s4, %s366_s14 }
  0x19   : > { %v193_v1 = vld [vmem:[%s192_s5] sm:$0xff]  ;;  %s423_s5 = sshll.u32 %s485_s19, 4  ;;  %s424_s5 = int_to_ptr.vmem [resolvable:$false] %s423_s5 }
  0x1a   : > { %vm195_vm0 = vcmp.eq.s32.totalorder %v193_v1, 0  ;;  %vm209_vm1 = vcmp.eq.s32.totalorder %v193_v1, 1  ;;  %vm237_vm2 = vcmp.eq.s32.totalorder %v193_v1, 3  ;;  %vm223_vm3 = vcmp.eq.s32.totalorder %v193_v1, 2  ;;  %s425_s6 = scalar_lea.vmem %s424_s5, 256  ;;  %p426_p0 = scmp.lt.s32.totalorder %s580_s22, %s424_s5 }
  0x1b   : > { %v359_v3 = vsel %vm195_vm0, 1.0, %v484_v2  ;;  %v360_v4 = vsel %vm209_vm1, 1.0, %v484_v2  ;;  %v362_v5 = vsel %vm237_vm2, 1.0, %v484_v2  ;;  %v361_v7 = vsel %vm223_vm3, 1.0, %v484_v2  ;;  %p427_p1 = scmp.lt.s32.totalorder %s425_s6, %s419_s30 }
  0x1c   : > { %v411_v6 = vpack.i.bf16 %v360_v4, %v359_v3  ;;  %242 = vperm.xlu1 %416, %v362_v5  }
  0x1d   : > { %p428_p2 = por %p427_p1, %p426_p0 }
  0x1e   : > { %412 = vperm.xlu0 %410, %v411_v6  }
  0x1f   : > { %p429_p3 = pnand %p428_p2, %p422_p13 }
  0x22   : > { %228 = vperm.xlu0 %410, %v361_v7  }
  0x9b   : > { %v243_v22 = vpop.permute.xlu1 %242 }
  0x9c   : > { %v249_v28 = vmul.f32 %v248_v21, %v243_v22 }
  0x9d   : > { %v413_v17 = vpop.permute.xlu0 %412 }
  0x9e   : > { %v415_v18 = vunpack.i.h.bf16 %v413_v17  ;;  %v414_v19 = vunpack.i.l.bf16 %v413_v17 }
  0xa0   : > { %v221_v23 = vmul.f32 %v415_v18, %v220_v16  ;;  %v207_v24 = vmul.f32 %v414_v19, %v206_v15 }
  0xa1   : > { %v229_v25 = vpop.permute.xlu0 %228 }
  0xa2   : > { %v222_v26 = vadd.f32 %v221_v23, %v207_v24  ;;  %v235_v27 = vmul.f32 %v234_v20, %v229_v25 }
  0xa4   : > { %v236_v29 = vadd.f32 %v235_v27, %v222_v26 }
  0xa6   : > { %v250_v30 = vadd.f32 %v249_v28, %v236_v29 }
  0xa8   : > { %251 = vadd.xlane.f32.xlu1 %v250_v30 }
 0x135   : > { %v252_v31 = vpop.xlane.xlu1 %251 }
 0x136   : > { %v254_v32 = vmul.f32 0.0078125, %v252_v31 }
 0x138   : > { %v255_v33 = vsub.f32 %v250_v30, %v254_v32 }
 0x13a   : > { %v256_v34 = vmul.f32 %v255_v33, %v255_v33 }
 0x13c   : > { %257 = vadd.xlane.f32.xlu0 %v256_v34 }
 0x1c9   : > { %v258_v35 = vpop.xlane.xlu0 %257 }
 0x1ca   : > { %v259_v36 = vmul.f32 0.0078125, %v258_v35 }
 0x1cc   : > { %v260_v37 = vadd.f32 1e-12, %v259_v36 }
 0x1ce   : > { %417 = vrsqrt.f32 %v260_v37 }
 0x1d8   : > { %v418_v38 = vpop.eup %417 }
 0x1d9   : > { %v262_v40 = vmul.f32 %v418_v38, %v255_v33 }
 0x1db   : > { %v270_v42 = vmul.f32 %v363_v39, %v262_v40 }
 0x1dd   : > { %v278_v43 = vadd.f32 %v364_v41, %v270_v42 }
 0x1df   : > { %279 = vst [vmem:[%s188_s20] sm:$0xff] %v278_v43 }
 0x1e0   : > { %432 = shalt.err (!%p429_p3)
}
 0x1e1   : > { %s433_s7 = scalar_lea.hbm %s578_s28, 128  ;;  %s437_s10 = scalar_lea.hbm %s624_s4, 256 }
 0x1e2   : > { %p434_p4 = scmp.ne.s32.totalorder %s578_s28, %s433_s7  ;;  %p438_p9 = scmp.lt.u32.totalorder %s578_s28, %s624_s4 }
 0x1e3   : > { %p439_p10 = scmp.lt.u32.totalorder %s437_s10, %s433_s7  ;;  %p441_p12 = scmp.lt.u32.totalorder %s433_s7, %s578_s28 }
 0x1e4   : > { %p435_p7 = pnand %p434_p4, %p549_p5 }
 0x1e5   : > { %p440_p11 = por %p439_p10, %p438_p9 }
 0x1e6   : > { %p436_p8 = pneg %p435_p7 }
 0x1e7   : > { %p442_p13 = por %p441_p12, %p440_p11 }
 0x1e9   : > { %p443_p0 = pnand %p442_p13, %p436_p8 }
 0x1eb   : > { %446 = shalt.err (!%p443_p0)
}
 0x1ec   : > { %369 = dma.vmem_to_hbm [thread:$0]  (%p549_p5), %s580_s22, 128, %s578_s28, %s281_s29  }
 0x1ed PF: > { %p375_p1 = scmp.ge.s32.totalorder %s481_s18, 2  ;;  %s306_s13 = sand.u32 1, %s469_s15  }
 0x1ee   : > { %s307_s14 = scalar_lea.sflag [#allocation3], %s306_s13 }
 0x1ef   : > { %p372_p2 = pnand %p375_p1, %p553_p6 }
 0x1f1   : > { %464 = dma.done.wait (!%p372_p2), %s307_s14, 128  }
 0x1f2   : > { %466 = vsyncadd (!%p372_p2), %s307_s14, 4294967168  ;;  %p14_p3 = scmp.ge.s32.totalorder %s536_s21, 4   ;;  %s627_s15 = smov %s473_s16 }
 0x1f3   : > { %s628_s16 = smov %s477_s17  ;;  %s629_s17 = smov %s547_s24 }
 0x1f4   : > { %s630_s18 = smov %s536_s21  ;;  %16 = sbr.rel (!%p14_p3) target bundleno = 3 (0x3), region = 71 }
 0x1fb   :  { %312 = vsyncpa [#allocation3], 1 }
 0x1fc   :  { %314 = vsyncpa [#allocation3 + $0x1], 1 }

</bundles_post_ra>
